<compile_context>
chip_gen: v6e
topology: v6e:2x2x1
jax: 0.10.0
libtpu: 0.0.40
codegen_flags: <defaults>
</compile_context>

<pallas_src>
import jax
import jax.numpy as jnp
from jax.experimental import pallas as pl
from jax.experimental.pallas import tpu as pltpu


_LANE_CHOICES = (1024, 512, 256, 128)  # widest lane-dense last dim that divides H*W*D
_TARGET_ELEMS = 1 << 20                # ~1M f32 elems / grid step: 12 MiB in + 4 MiB out
_VMEM_LIMIT_BYTES = 40 << 20           # explicit scoped-VMEM bump (32 MiB double-buffered)


def _grayscale_kernel(x_ref, o_ref):
    # x_ref: (3, tM, L) float32 in [0, 1]; o_ref: (1, tM, L) float32
    r = x_ref[0]
    g = x_ref[1]
    b = x_ref[2]

    # ToPILImage on a float tensor: pic.mul(255).byte() -> truncation (inputs are in [0, 1]).
    r8 = jnp.floor(r * 255.0)
    g8 = jnp.floor(g * 255.0)
    b8 = jnp.floor(b * 255.0)

    # PIL "L" conversion (ITU-R 601-2 fixed point with rounding):
    #   L = (19595*R + 38470*G + 7471*B + 0x8000) >> 16
    # Every intermediate is an integer < 2^24 and the 2^-16 scale is exact, so the f32 path
    # is bit-identical to the integer >>16 path.
    acc = r8 * 19595.0 + g8 * 38470.0 + b8 * 7471.0 + 32768.0
    o_ref[0] = jnp.floor(acc * (1.0 / 65536.0))


def grayscale3d(img):
    """img: (3, H, W, D) float32 in [0, 1]  ->  (1, H, W, D) float32."""
    C, H, W, D = img.shape
    assert C == 3, "Grayscale3D expects RGB (3-channel) input"
    N = H * W * D

    # Widest lane count dividing N -> pure (free) reshape, zero extra HBM traffic.
    L = next((l for l in _LANE_CHOICES if N % l == 0), None)

    x = img.reshape(3, N)  # free reshape: trailing (H, W, D) dims are contiguous
    if L is None:
        # Ragged fallback (N % 128 != 0): pad to the next multiple of 128.  This is the only
        # case that costs an extra HBM round trip; realistic volume shapes never hit it.
        L = 128
        pad = (-N) % L
        x = jnp.pad(x, ((0, 0), (0, pad)))
    else:
        pad = 0

    M = (N + pad) // L
    x = x.reshape(3, M, L)

    # Rows per grid step: ~1M elements, or the whole array if smaller.  tM is either a
    # multiple of 8 (TARGET//L >= 1024) or equal to the full M dim, satisfying the (8,128)
    # block-shape rule.  Pallas masks the (possible) partial edge block along M.
    tM = min(M, max(_TARGET_ELEMS // L, 8))
    grid_m = pl.cdiv(M, tM)

    out_flat = pl.pallas_call(
        _grayscale_kernel,
        out_shape=jax.ShapeDtypeStruct((1, M, L), jnp.float32),
        grid_spec=pltpu.PrefetchScalarGridSpec(
            num_scalar_prefetch=0,
            grid=(grid_m,),
            in_specs=[pl.BlockSpec((3, tM, L), lambda i: (0, i, 0))],
            out_specs=pl.BlockSpec((1, tM, L), lambda i: (0, i, 0)),
        ),
        compiler_params=pltpu.CompilerParams(
            dimension_semantics=("parallel",),
            vmem_limit_bytes=_VMEM_LIMIT_BYTES,
        ),
        cost_estimate=pl.CostEstimate(
            flops=10 * M * L,
            transcendentals=0,
            bytes_accessed=16 * M * L,  # 3 channels in + 1 out, f32
        ),
    )(x)

    out = out_flat.reshape(1, M * L)
    if pad:
        out = out[:, :N]
    return out.reshape(1, H, W, D)


def _grayscale3d_ref(img):
    """Pure-JAX reference of the exact PyTorch/PIL semantics (integer path)."""
    x8 = jnp.floor(img * 255.0).astype(jnp.int32)  # (3, H, W, D)
    r, g, b = x8[0], x8[1], x8[2]
    l = (r * 19595 + g * 38470 + b * 7471 + 32768) >> 16
    return l[None].astype(jnp.float32)  # (1, H, W, D)


if __name__ == "__main__":
    key = jax.random.PRNGKey(0)

    shapes = [
        (3, 16, 16, 8),    # N = 2048  -> L=1024, single tile, no padding
        (3, 10, 10, 3),    # N = 300   -> exercises the rare ragged (pad) fallback
        (3, 64, 64, 128),  # N = 524288 -> L=1024, large lane-dense tile path
    ]

    for shape in shapes:
        key, sub = jax.random.split(key)
        img = jax.random.uniform(sub, shape, dtype=jnp.float32)  # RGB in [0, 1]

        out = jax.block_until_ready(grayscale3d(img))
        expected = _grayscale3d_ref(img)

        C, H, W, D = shape
        assert out.shape == (1, H, W, D), out.shape
        assert out.dtype == jnp.float32, out.dtype
        assert bool(jnp.all(out == expected)), f"kernel output mismatch vs reference for {shape}"

    print("KERNEL_OK")
</pallas_src>

<mosaic_0001>
module attributes {stable_mosaic.version = 11 : i64} {
  func.func @_grayscale_kernel(%arg0: i32, %arg1: memref<3x2x1024xf32, #tpu.memory_space<vmem>>, %arg2: memref<1x2x1024xf32, #tpu.memory_space<vmem>>) attributes {dimension_semantics = [#tpu.dimension_semantics<parallel>], iteration_bounds = array<i64: 1>, scalar_prefetch = 0 : i64, scratch_operands = 0 : i64, tpu.core_type = #tpu.core_type<tc>, window_params = [{transform_indices = @transform_0, window_bounds = array<i64: 3, 2, 1024>}, {transform_indices = @transform_1, window_bounds = array<i64: 1, 2, 1024>}]} {
    %c0 = arith.constant 0 : index
    %c0_0 = arith.constant 0 : index
    %c0_1 = arith.constant 0 : index
    %0 = vector.load %arg1[%c0, %c0_0, %c0_1] : memref<3x2x1024xf32, #tpu.memory_space<vmem>>, vector<1x2x1024xf32>
    %1 = vector.shape_cast %0 : vector<1x2x1024xf32> to vector<2x1024xf32>
    %c1 = arith.constant 1 : index
    %c0_2 = arith.constant 0 : index
    %c0_3 = arith.constant 0 : index
    %2 = vector.load %arg1[%c1, %c0_2, %c0_3] : memref<3x2x1024xf32, #tpu.memory_space<vmem>>, vector<1x2x1024xf32>
    %3 = vector.shape_cast %2 : vector<1x2x1024xf32> to vector<2x1024xf32>
    %c2 = arith.constant 2 : index
    %c0_4 = arith.constant 0 : index
    %c0_5 = arith.constant 0 : index
    %4 = vector.load %arg1[%c2, %c0_4, %c0_5] : memref<3x2x1024xf32, #tpu.memory_space<vmem>>, vector<1x2x1024xf32>
    %5 = vector.shape_cast %4 : vector<1x2x1024xf32> to vector<2x1024xf32>
    %cst = arith.constant 2.550000e+02 : f32
    %6 = vector.broadcast %cst : f32 to vector<2x1024xf32>
    %7 = arith.mulf %1, %6 : vector<2x1024xf32>
    %8 = math.floor %7 : vector<2x1024xf32>
    %cst_6 = arith.constant 2.550000e+02 : f32
    %9 = vector.broadcast %cst_6 : f32 to vector<2x1024xf32>
    %10 = arith.mulf %3, %9 : vector<2x1024xf32>
    %11 = math.floor %10 : vector<2x1024xf32>
    %cst_7 = arith.constant 2.550000e+02 : f32
    %12 = vector.broadcast %cst_7 : f32 to vector<2x1024xf32>
    %13 = arith.mulf %5, %12 : vector<2x1024xf32>
    %14 = math.floor %13 : vector<2x1024xf32>
    %cst_8 = arith.constant 1.959500e+04 : f32
    %15 = vector.broadcast %cst_8 : f32 to vector<2x1024xf32>
    %16 = arith.mulf %8, %15 : vector<2x1024xf32>
    %cst_9 = arith.constant 3.847000e+04 : f32
    %17 = vector.broadcast %cst_9 : f32 to vector<2x1024xf32>
    %18 = arith.mulf %11, %17 : vector<2x1024xf32>
    %19 = arith.addf %16, %18 : vector<2x1024xf32>
    %cst_10 = arith.constant 7.471000e+03 : f32
    %20 = vector.broadcast %cst_10 : f32 to vector<2x1024xf32>
    %21 = arith.mulf %14, %20 : vector<2x1024xf32>
    %22 = arith.addf %19, %21 : vector<2x1024xf32>
    %cst_11 = arith.constant 3.276800e+04 : f32
    %23 = vector.broadcast %cst_11 : f32 to vector<2x1024xf32>
    %24 = arith.addf %22, %23 : vector<2x1024xf32>
    %cst_12 = arith.constant 1.52587891E-5 : f32
    %25 = vector.broadcast %cst_12 : f32 to vector<2x1024xf32>
    %26 = arith.mulf %24, %25 : vector<2x1024xf32>
    %27 = math.floor %26 : vector<2x1024xf32>
    %c0_13 = arith.constant 0 : index
    %c0_14 = arith.constant 0 : index
    %c0_15 = arith.constant 0 : index
    %28 = vector.load %arg2[%c0_13, %c0_14, %c0_15] : memref<1x2x1024xf32, #tpu.memory_space<vmem>>, vector<1x2x1024xf32>
    %29 = vector.shape_cast %28 : vector<1x2x1024xf32> to vector<2x1024xf32>
    %30 = vector.shape_cast %27 : vector<2x1024xf32> to vector<1x2x1024xf32>
    tpu.vector_store %arg2[%c0_13, %c0_14, %c0_15], %30 {strides = array<i32>} : memref<1x2x1024xf32, #tpu.memory_space<vmem>>, vector<1x2x1024xf32>,
    return
  }
  func.func @transform_0(%arg0: i32) -> (i32, i32, i32) {
    %c0_i32 = arith.constant 0 : i32
    %c0_i32_0 = arith.constant 0 : i32
    %c0_i32_1 = arith.constant 0 : i32
    return %c0_i32, %arg0, %c0_i32_0 : i32, i32, i32
  }
  func.func @transform_1(%arg0: i32) -> (i32, i32, i32) {
    %c0_i32 = arith.constant 0 : i32
    %c0_i32_0 = arith.constant 0 : i32
    %c0_i32_1 = arith.constant 0 : i32
    return %c0_i32, %arg0, %c0_i32_0 : i32, i32, i32
  }
}

</mosaic_0001>

<bundles_post_ra>
// kernel: tpu_custom_call.1
= control target key start
LH: loop header
LB: loop body
LE: loop exit
PB: predicated region body
PF: predicated region fallthrough
CT: control target
= control target key end

     0   :  { %6 = vsyncpa [#allocation3], 0  ;;  %s144_s0 = inlined_call_operand.hbm [shape: f32[3,2,1024], index: 0, kind: input, shape index: {}]   ;;  %s145_s1 = inlined_call_operand.hbm [shape: f32[1,2,1024], index: 1, kind: output, shape index: {}]  }
   0x1   :  { %7 = vsyncpa [#allocation4], 0  ;;  %s124_s6 = smov [#allocation2]  }
   0x2   :  { %s13_s7 = sshll.u32 %s124_s6, 4  ;;  %s14_s7 = int_to_ptr.vmem [resolvable:$true] %s13_s7 }
   0x3   :  { %s88_s8 = scalar_lea.vmem %s14_s7, 768  ;;  %p93_p1 = scmp.lt.s32.totalorder %s14_s7, %s14_s7 }
   0x4   :  { %p89_p0 = scmp.ne.s32.totalorder %s14_s7, %s88_s8  ;;  %p94_p2 = scmp.lt.s32.totalorder %s88_s8, %s88_s8 }
   0x6   :  { %p95_p3 = por %p94_p2, %p93_p1 }
   0x8   :  { %p96_p4 = pnand %p95_p3, %p89_p0 }
   0xa   :  { %99 = shalt.err (!%p96_p4)
}
   0xb   :  { %s125_s9 = smov 256   ;;  %s126_s10 = smov 16  }
   0xc   :  { %19 = dma.hbm_to_vmem [thread:$0]  %s144_s0, 768, %s14_s7, [#allocation3], %s125_s9, %s125_s9, %s126_s10  }
   0xd   :  { %120 = dma.done.wait [#allocation3], 768  }
   0xe   :  { %121 = vsyncadd [#allocation3], 4294966528  ;;  %v23_v0 = vld [vmem:[#allocation2] sm:$0xff]  ;;  %v26_v1 = vld [vmem:[#allocation2 + $0x10] sm:$0xff]  ;;  %s127_s0 = smov [#allocation5]  }
   0xf   :  { %v29_v2 = vld [vmem:[#allocation2 + $0x20] sm:$0xff]  ;;  %v31_v3 = vmul.f32 255.0, %v23_v0  ;;  %v35_v4 = vmul.f32 255.0, %v26_v1  ;;  %v24_v6 = vld [vmem:[#allocation2 + $0x8] sm:$0xff]  ;;  %v27_v7 = vld [vmem:[#allocation2 + $0x18] sm:$0xff]  ;;  %s67_s13 = sshll.u32 %s127_s0, 4  ;;  %s68_s13 = int_to_ptr.vmem [resolvable:$true] %s67_s13 }
  0x10   :  { %v39_v5 = vmul.f32 255.0, %v29_v2  ;;  %v30_v8 = vld [vmem:[#allocation2 + $0x28] sm:$0xff]  ;;  %v32_v9 = vmul.f32 255.0, %v24_v6  ;;  %v36_v10 = vmul.f32 255.0, %v27_v7  ;;  %s100_s14 = scalar_lea.vmem %s68_s13, 256  ;;  %p105_p6 = scmp.lt.s32.totalorder %s68_s13, %s68_s13 }
  0x11   :  { %v40_v11 = vmul.f32 255.0, %v30_v8  ;;  %v33_v12 = vfloor.f32 %v31_v3  ;;  %v37_v13 = vfloor.f32 %v35_v4  ;;  %p101_p5 = scmp.ne.s32.totalorder %s68_s13, %s100_s14  ;;  %p106_p7 = scmp.lt.s32.totalorder %s100_s14, %s100_s14 }
  0x12   :  { %v41_v14 = vfloor.f32 %v39_v5  ;;  %v34_v15 = vfloor.f32 %v32_v9  ;;  %v38_v16 = vfloor.f32 %v36_v10 }
  0x13   :  { %v42_v17 = vfloor.f32 %v40_v11  ;;  %v43_v18 = vmul.f32 19595.0, %v33_v12  ;;  %v45_v19 = vmul.f32 38470.0, %v37_v13  ;;  %p107_p8 = por %p106_p7, %p105_p6 }
  0x14   :  { %v49_v20 = vmul.f32 7471.0, %v41_v14  ;;  %v44_v21 = vmul.f32 19595.0, %v34_v15  ;;  %v46_v22 = vmul.f32 38470.0, %v38_v16 }
  0x15   :  { %v50_v23 = vmul.f32 7471.0, %v42_v17  ;;  %v47_v24 = vadd.f32 %v45_v19, %v43_v18  ;;  %p108_p9 = pnand %p107_p8, %p101_p5 }
  0x16   :  { %v48_v25 = vadd.f32 %v46_v22, %v44_v21 }
  0x17   :  { %v51_v26 = vadd.f32 %v49_v20, %v47_v24 }
  0x18   :  { %v52_v27 = vadd.f32 %v50_v23, %v48_v25 }
  0x19   :  { %v53_v28 = vadd.f32 32768.0, %v51_v26 }
  0x1a   :  { %v54_v29 = vadd.f32 32768.0, %v52_v27 }
  0x1b   :  { %v55_v30 = vmul.f32 1.5258789e-05, %v53_v28 }
  0x1c   :  { %v56_v31 = vmul.f32 1.5258789e-05, %v54_v29 }
  0x1d   :  { %v57_v32 = vfloor.f32 %v55_v30 }
  0x1e   :  { %v58_v33 = vfloor.f32 %v56_v31 }
  0x1f   :  { %59 = vst [vmem:[#allocation5] sm:$0xff] %v57_v32 }
  0x20   :  { %60 = vst [vmem:[#allocation5 + $0x8] sm:$0xff] %v58_v33 }
  0x21   :  { %111 = shalt.err (!%p108_p9)
}
  0x22   :  { %70 = dma.vmem_to_hbm [thread:$0]  %s68_s13, 256, %s145_s1, [#allocation4]  }
  0x23   :  { %122 = dma.done.wait [#allocation4], 256  }
  0x24   :  { %123 = vsyncadd [#allocation4], 4294967040 }
  0x25   :  { %74 = vsyncpa [#allocation3], 1 }
  0x26   :  { %75 = vsyncpa [#allocation4], 1 }

</bundles_post_ra>
